<compile_context>
chip_gen: v7x
topology: tpu7x:2x2x1
jax: 0.10.0
libtpu: 0.0.40
codegen_flags: <defaults>
</compile_context>

<pallas_src>
import math
import functools
import numpy as np
import jax
import jax.numpy as jnp
from jax import lax
from jax.experimental import pallas as pl
from jax.experimental.pallas import tpu as pltpu  # noqa: F401

HIGHEST = jax.lax.Precision.HIGHEST

# ---- packed parameter-slab layout (rows x 128 lanes, f32) -------------------
_LANES = 128
_ROW_WRGB = 0      # 128 rows : from_RGB operator, (48,64) zero-padded to (128,128)
_ROW_W1 = 128      # 128 rows : Conv_1 per-image operator, (64,80) padded to (128,128)
_ROW_W1MSD = 256   # 1 row    : rank-1 MSD-channel contribution of Conv_1 (1,80) padded
_ROW_BRGB = 257    # 1 row    : from_RGB bias (1,64) padded
_ROW_B1 = 258      # 1 row    : Conv_1 bias (1,80) padded
_ROW_W2EFF = 259   # 1 row    : fused (Conv_2 @ Linear) weight, transposed, (1,80) padded
_ROW_BEFF = 260    # 1 row    : fused bias scalar in lane 0, rest zero
_SLAB_ROWS = 264   # padded to a multiple of 8 sublanes


def _disc_kernel(x_ref, slab_ref, out_ref, *, n_batch, c0_hw):
    f32 = jnp.float32

    # Static slices into the single packed parameter slab (zero-cost views;
    # the 128-row blocks are tile-aligned).
    wrgb = slab_ref[pl.ds(_ROW_WRGB, _LANES), :]      # (128, 128)
    w1 = slab_ref[pl.ds(_ROW_W1, _LANES), :]          # (128, 128)
    w1msd = slab_ref[pl.ds(_ROW_W1MSD, 1), :]         # (1, 128)
    brgb = slab_ref[pl.ds(_ROW_BRGB, 1), :]           # (1, 128)
    b1 = slab_ref[pl.ds(_ROW_B1, 1), :]               # (1, 128)
    w2row = slab_ref[pl.ds(_ROW_W2EFF, 1), :]         # (1, 128)
    beffr = slab_ref[pl.ds(_ROW_BEFF, 1), :]          # (1, 128), b_eff at lane 0

    # ---- from_RGB: equalized 1x1 conv (3 -> C0) + LeakyReLU(0.2) ------------
    # (He scales already folded into the slab host-side.)
    act = jnp.dot(x_ref[...], wrgb, preferred_element_type=f32,
                  precision=HIGHEST) + brgb                       # (N, 128)
    act = jnp.maximum(act, 0.2 * act)                             # padded lanes stay 0

    # ---- minibatch standard deviation ---------------------------------------
    # Unbiased std over the batch per (c,h,w), then mean over the REAL lanes.
    # Padded lanes are exactly zero for every image -> zero std -> no effect.
    mu = jnp.sum(act, axis=0, keepdims=True) * (1.0 / n_batch)
    var = jnp.sum((act - mu) ** 2, axis=0, keepdims=True) * (1.0 / (n_batch - 1))
    msd = jnp.sum(jnp.sqrt(var), keepdims=True) * (1.0 / float(c0_hw))   # (1, 1)

    # ---- D_ConvBlock.Conv_1: 3x3 'same' conv (Cin -> Cin) + LReLU -----------
    # The spatially/batch-constant MSD channel contributes msd * (row-sum of
    # its operator block): a rank-1 term, never materialized/concatenated.
    h1 = (jnp.dot(act, w1, preferred_element_type=f32, precision=HIGHEST)
          + msd * w1msd + b1)                                     # (N, 128)
    h1 = jnp.maximum(h1, 0.2 * h1)

    # ---- fused Conv_2 (4x4 'valid', no activation) + final Linear -----------
    # Host-fused to a single (Cin*HW,)->scalar map: lane-reduce against the
    # fused weight row; b_eff sits in lane 0 of an otherwise-zero row and is
    # recovered by the same reduction.
    out_ref[...] = (jnp.sum(h1 * w2row, axis=-1, keepdims=True)
                    + jnp.sum(beffr, axis=-1, keepdims=True))     # (N, 1)


def _conv1_assembly(H, W):
    """A[t, q, p] = 1 iff 3x3 tap t (t = kh*3+kw) of output pixel p = i*W+j
    reads input pixel q = (i+kh-1)*W + (j+kw-1) (stride 1, zero padding 1)."""
    HW = H * W
    A = np.zeros((9, HW, HW), np.float32)
    for kh in range(3):
        for kw in range(3):
            t = kh * 3 + kw
            for i in range(H):
                for j in range(W):
                    ii, jj = i + kh - 1, j + kw - 1
                    if 0 <= ii < H and 0 <= jj < W:
                        A[t, ii * W + jj, i * W + j] = 1.0
    return A


def init_discriminator_params(key, c0, ch_latent):
    """Equalized init: weights ~ N(0,1), biases = 0 (He scale applied in fwd)."""
    cin = c0 + 1
    k = jax.random.split(key, 4)
    return dict(
        w_rgb=jax.random.normal(k[0], (3, c0), jnp.float32),            # 1x1 conv (in,out)
        b_rgb=jnp.zeros((1, c0), jnp.float32),
        w1=jax.random.normal(k[1], (9, cin, cin), jnp.float32),         # (kh*3+kw, in, out)
        b1=jnp.zeros((1, cin), jnp.float32),
        w2=jax.random.normal(k[2], (16, cin, ch_latent), jnp.float32),  # (kh*4+kw, in, out)
        b2=jnp.zeros((1, ch_latent), jnp.float32),
        w_lin=jax.random.normal(k[3], (ch_latent, 1), jnp.float32),
        b_lin=jnp.zeros((1, 1), jnp.float32),
    )


def _fold_params_to_slab(params, *, c0, ch_latent, H, W):
    """One-time host-side (numpy) folding of all parameters into a single
    lane-padded (264, 128) slab.  Column layout everywhere: c*HW + i*W + j."""
    HW = H * W
    cin = c0 + 1
    assert 3 * HW <= _LANES and cin * HW <= _LANES and c0 * HW <= _LANES

    # He constants sqrt(2/fan_in); module computes (Wx+b)*scale, so the scale
    # is folded into BOTH weight and bias (bias is zero-initialized anyway).
    scale_rgb = math.sqrt(2.0 / 3.0)
    scale_c1 = math.sqrt(2.0 / (cin * 9))
    scale_c2 = math.sqrt(2.0 / (cin * 16))
    scale_lin = math.sqrt(2.0 / ch_latent)

    p = {k: np.asarray(v, np.float32) for k, v in params.items()}
    eye_hw = np.eye(HW, dtype=np.float32)
    ones_hw = np.ones((1, HW), np.float32)

    # from_RGB 1x1 conv as a block-diagonal (3*HW, C0*HW) operator.
    w_rgb_op = scale_rgb * np.kron(p['w_rgb'], eye_hw)               # (48, 64)
    b_rgb_op = scale_rgb * np.kron(p['b_rgb'], ones_hw)              # (1, 64)

    # Conv_1 (3x3 'same') as a dense per-image operator; split real channels
    # from the constant MSD channel (rank-1 row-sum).
    A1 = _conv1_assembly(H, W)                                       # (9, HW, HW)
    w1_full = scale_c1 * np.einsum('tqp,tio->iqop', A1,
                                   p['w1']).reshape(cin * HW, cin * HW)
    w1_main = w1_full[:c0 * HW, :]                                   # (64, 80)
    w1_msd = w1_full[c0 * HW:, :].sum(axis=0)                        # (80,)
    b1_op = scale_c1 * np.kron(p['b1'], ones_hw)                     # (1, 80)

    # Conv_2 (4x4 'valid' -> 1x1 spatial) as a (Cin*HW, CL) operator, fused
    # with the final Linear (no activation in between).
    w2_op = scale_c2 * np.transpose(p['w2'], (1, 0, 2)).reshape(cin * HW, ch_latent)
    b2_op = scale_c2 * p['b2']                                       # (1, CL)
    wlin_op = scale_lin * p['w_lin']                                 # (CL, 1)
    blin_op = scale_lin * p['b_lin']                                 # (1, 1)
    w2_eff = (w2_op @ wlin_op)[:, 0]                                 # (80,)
    b_eff = (b2_op @ wlin_op + blin_op).item()

    slab = np.zeros((_SLAB_ROWS, _LANES), np.float32)
    slab[_ROW_WRGB:_ROW_WRGB + 3 * HW, :c0 * HW] = w_rgb_op
    slab[_ROW_W1:_ROW_W1 + c0 * HW, :cin * HW] = w1_main
    slab[_ROW_W1MSD, :cin * HW] = w1_msd
    slab[_ROW_BRGB, :c0 * HW] = b_rgb_op[0]
    slab[_ROW_B1, :cin * HW] = b1_op[0]
    slab[_ROW_W2EFF, :cin * HW] = w2_eff
    slab[_ROW_BEFF, 0] = b_eff
    return jnp.asarray(slab)


def build_discriminator(params, *, c0, ch_latent, H=4, W=4):
    """Fold parameters ONCE and return a jitted forward(x_nchw, alpha)."""
    slab = _fold_params_to_slab(params, c0=c0, ch_latent=ch_latent, H=H, W=W)
    HW = H * W

    def _forward(x_nchw, alpha, slab):
        # TODO(synk): stage>0 fade-in path (bilinear Downsampling + alpha
        # blend) is dead code for the stage-0 module; alpha is unused.
        del alpha
        N = x_nchw.shape[0]
        assert N >= 2, "minibatch stddev needs batch >= 2 (torch.std unbiased)"
        # NCHW -> (N, 3*HW) channel-major rows, lane-padded to 128.
        x_mat = x_nchw.reshape(N, 3 * HW).astype(jnp.float32)
        x_pad = jnp.pad(x_mat, ((0, 0), (0, _LANES - 3 * HW)))
        kernel = functools.partial(_disc_kernel, n_batch=N, c0_hw=c0 * HW)
        # TODO(synk): for large N, add a ("parallel",) batch grid with a
        # two-pass MSD so the second TensorCore on v7x is used; not needed at N=2.
        return pl.pallas_call(
            kernel,
            out_shape=jax.ShapeDtypeStruct((N, 1), jnp.float32),
        )(x_pad, slab)

    fwd = jax.jit(_forward)
    return lambda x, alpha=1.0: fwd(x, alpha, slab)


def reference_forward(x_nchw, params, *, c0, ch_latent):
    """Pure-JAX (XLA conv, f32 HIGHEST) reference mirroring the PyTorch forward."""
    N = x_nchw.shape[0]
    cin = c0 + 1
    scale_rgb = math.sqrt(2.0 / 3.0)
    scale_c1 = math.sqrt(2.0 / (cin * 9))
    scale_c2 = math.sqrt(2.0 / (cin * 16))
    scale_lin = math.sqrt(2.0 / ch_latent)
    lrelu = lambda v: jnp.where(v >= 0, v, 0.2 * v)

    def conv(x, w_oihw, b, pad):
        y = lax.conv_general_dilated(x, w_oihw, (1, 1), pad,
                                     dimension_numbers=('NCHW', 'OIHW', 'NCHW'),
                                     precision=HIGHEST)
        return y + b.reshape(1, -1, 1, 1)

    w_rgb = params['w_rgb'].T[:, :, None, None]
    x = lrelu(conv(x_nchw, w_rgb, params['b_rgb'].reshape(-1), 'VALID') * scale_rgb)

    std = jnp.std(x, axis=0, ddof=1).mean()
    msd = jnp.broadcast_to(std, (N, 1, x.shape[2], x.shape[3]))
    xc = jnp.concatenate([x, msd], axis=1)

    w1 = jnp.transpose(params['w1'].reshape(3, 3, cin, cin), (3, 2, 0, 1))
    h = lrelu(conv(xc, w1, params['b1'].reshape(-1), [(1, 1), (1, 1)]) * scale_c1)

    w2 = jnp.transpose(params['w2'].reshape(4, 4, cin, ch_latent), (3, 2, 0, 1))
    h = conv(h, w2, params['b2'].reshape(-1), 'VALID') * scale_c2   # (N, CL, 1, 1)

    h = h.reshape(-1, ch_latent)
    return (jnp.dot(h, params['w_lin'], precision=HIGHEST) + params['b_lin']) * scale_lin


if __name__ == "__main__":
    key = jax.random.PRNGKey(0)
    k_x, k_p = jax.random.split(key)

    N, C0, CH_LATENT = 2, 4, 32       # batch=2, depth_list=[4], ch_Latent=32
    H = W = 4                         # stage-0 resolution (4x4 RGB)
    x = jax.random.normal(k_x, (N, 3, H, W), jnp.float32)   # NCHW, like PyTorch
    alpha = 1.0

    params = init_discriminator_params(k_p, C0, CH_LATENT)

    forward = build_discriminator(params, c0=C0, ch_latent=CH_LATENT, H=H, W=W)
    out = jax.block_until_ready(forward(x, alpha))

    ref = reference_forward(x, params, c0=C0, ch_latent=CH_LATENT)
    assert out.shape == (N, 1)
    # In-kernel matmuls run at HIGHEST precision; only host-side folding /
    # accumulation-order differences vs the f32 conv reference remain.
    assert jnp.allclose(out, ref, rtol=1e-3, atol=1e-3), (out, ref)
    print("KERNEL_OK")
</pallas_src>

<mosaic_0001>
module attributes {stable_mosaic.version = 11 : i64} {
  func.func @_disc_kernel(%arg0: memref<2x128xf32, #tpu.memory_space<vmem>>, %arg1: memref<264x128xf32, #tpu.memory_space<vmem>>, %arg2: memref<2x1xf32, #tpu.memory_space<vmem>>) attributes {dimension_semantics = [], scalar_prefetch = 0 : i64, scratch_operands = 0 : i64, tpu.core_type = #tpu.core_type<tc>} {
    %c0 = arith.constant 0 : index
    %c0_0 = arith.constant 0 : index
    %0 = vector.load %arg1[%c0, %c0_0] : memref<264x128xf32, #tpu.memory_space<vmem>>, vector<128x128xf32>
    %c128 = arith.constant 128 : index
    %c0_1 = arith.constant 0 : index
    %1 = vector.load %arg1[%c128, %c0_1] : memref<264x128xf32, #tpu.memory_space<vmem>>, vector<128x128xf32>
    %c256 = arith.constant 256 : index
    %c0_2 = arith.constant 0 : index
    %2 = vector.load %arg1[%c256, %c0_2] : memref<264x128xf32, #tpu.memory_space<vmem>>, vector<1x128xf32>
    %c257 = arith.constant 257 : index
    %c0_3 = arith.constant 0 : index
    %3 = vector.load %arg1[%c257, %c0_3] : memref<264x128xf32, #tpu.memory_space<vmem>>, vector<1x128xf32>
    %c258 = arith.constant 258 : index
    %c0_4 = arith.constant 0 : index
    %4 = vector.load %arg1[%c258, %c0_4] : memref<264x128xf32, #tpu.memory_space<vmem>>, vector<1x128xf32>
    %c259 = arith.constant 259 : index
    %c0_5 = arith.constant 0 : index
    %5 = vector.load %arg1[%c259, %c0_5] : memref<264x128xf32, #tpu.memory_space<vmem>>, vector<1x128xf32>
    %c260 = arith.constant 260 : index
    %c0_6 = arith.constant 0 : index
    %6 = vector.load %arg1[%c260, %c0_6] : memref<264x128xf32, #tpu.memory_space<vmem>>, vector<1x128xf32>
    %c0_7 = arith.constant 0 : index
    %c0_8 = arith.constant 0 : index
    %7 = vector.load %arg0[%c0_7, %c0_8] : memref<2x128xf32, #tpu.memory_space<vmem>>, vector<2x128xf32>
    %cst = arith.constant dense<0.000000e+00> : vector<2x128xf32>
    %8 = tpu.matmul %7, %0, %cst {dimension_numbers = #tpu.dot_dimension_numbers<[1], [0], [0], [1], [0, 0, 1, 1], [], []>, precision = #tpu.contract_precision<fp32>} : vector<2x128xf32>, vector<128x128xf32>, vector<2x128xf32> -> vector<2x128xf32>
    %9 = vector.broadcast %3 : vector<1x128xf32> to vector<2x128xf32>
    %10 = arith.addf %8, %9 : vector<2x128xf32>
    %cst_9 = arith.constant 2.000000e-01 : f32
    %11 = vector.broadcast %cst_9 : f32 to vector<2x128xf32>
    %12 = arith.mulf %11, %10 : vector<2x128xf32>
    %13 = arith.maximumf %10, %12 : vector<2x128xf32>
    %cst_10 = arith.constant dense<0.000000e+00> : vector<128xf32>
    %14 = vector.multi_reduction <add>, %13, %cst_10 [0] : vector<2x128xf32> to vector<128xf32>
    %15 = vector.shape_cast %14 : vector<128xf32> to vector<1x128xf32>
    %cst_11 = arith.constant 5.000000e-01 : f32
    %16 = vector.broadcast %cst_11 : f32 to vector<1x128xf32>
    %17 = arith.mulf %15, %16 : vector<1x128xf32>
    %18 = vector.broadcast %17 : vector<1x128xf32> to vector<2x128xf32>
    %19 = arith.subf %13, %18 : vector<2x128xf32>
    %20 = arith.mulf %19, %19 : vector<2x128xf32>
    %cst_12 = arith.constant dense<0.000000e+00> : vector<128xf32>
    %21 = vector.multi_reduction <add>, %20, %cst_12 [0] : vector<2x128xf32> to vector<128xf32>
    %22 = vector.shape_cast %21 : vector<128xf32> to vector<1x128xf32>
    %cst_13 = arith.constant 1.000000e+00 : f32
    %23 = vector.broadcast %cst_13 : f32 to vector<1x128xf32>
    %24 = arith.mulf %22, %23 : vector<1x128xf32>
    %25 = math.sqrt %24 : vector<1x128xf32>
    %26 = vector.shape_cast %25 : vector<1x128xf32> to vector<1x1x128xf32>
    %cst_14 = arith.constant dense<0.000000e+00> : vector<1xf32>
    %27 = vector.multi_reduction <add>, %26, %cst_14 [1, 2] : vector<1x1x128xf32> to vector<1xf32>
    %28 = vector.shape_cast %27 : vector<1xf32> to vector<1x1x1xf32>
    %29 = vector.extract %28[0, 0, 0] : f32 from vector<1x1x1xf32>
    %30 = vector.broadcast %29 : f32 to vector<1x1xf32>
    %cst_15 = arith.constant 1.562500e-02 : f32
    %31 = vector.broadcast %cst_15 : f32 to vector<1x1xf32>
    %32 = arith.mulf %30, %31 : vector<1x1xf32>
    %cst_16 = arith.constant dense<0.000000e+00> : vector<2x128xf32>
    %33 = tpu.matmul %13, %1, %cst_16 {dimension_numbers = #tpu.dot_dimension_numbers<[1], [0], [0], [1], [0, 0, 1, 1], [], []>, precision = #tpu.contract_precision<fp32>} : vector<2x128xf32>, vector<128x128xf32>, vector<2x128xf32> -> vector<2x128xf32>
    %34 = vector.broadcast %32 : vector<1x1xf32> to vector<1x128xf32>
    %35 = arith.mulf %34, %2 : vector<1x128xf32>
    %36 = vector.broadcast %35 : vector<1x128xf32> to vector<2x128xf32>
    %37 = arith.addf %33, %36 : vector<2x128xf32>
    %38 = vector.broadcast %4 : vector<1x128xf32> to vector<2x128xf32>
    %39 = arith.addf %37, %38 : vector<2x128xf32>
    %cst_17 = arith.constant 2.000000e-01 : f32
    %40 = vector.broadcast %cst_17 : f32 to vector<2x128xf32>
    %41 = arith.mulf %40, %39 : vector<2x128xf32>
    %42 = arith.maximumf %39, %41 : vector<2x128xf32>
    %43 = vector.broadcast %5 : vector<1x128xf32> to vector<2x128xf32>
    %44 = arith.mulf %42, %43 : vector<2x128xf32>
    %cst_18 = arith.constant dense<0.000000e+00> : vector<2xf32>
    %45 = vector.multi_reduction <add>, %44, %cst_18 [1] : vector<2x128xf32> to vector<2xf32>
    %46 = vector.shape_cast %45 : vector<2xf32> to vector<2x1xf32>
    %cst_19 = arith.constant dense<0.000000e+00> : vector<1xf32>
    %47 = vector.multi_reduction <add>, %6, %cst_19 [1] : vector<1x128xf32> to vector<1xf32>
    %48 = vector.shape_cast %47 : vector<1xf32> to vector<1x1xf32>
    %49 = vector.broadcast %48 : vector<1x1xf32> to vector<2x1xf32>
    %50 = arith.addf %46, %49 : vector<2x1xf32>
    %c0_20 = arith.constant 0 : index
    %c0_21 = arith.constant 0 : index
    %51 = vector.load %arg2[%c0_20, %c0_21] : memref<2x1xf32, #tpu.memory_space<vmem>>, vector<2x1xf32>
    tpu.vector_store %arg2[%c0_20, %c0_21], %50 {strides = array<i32>} : memref<2x1xf32, #tpu.memory_space<vmem>>, vector<2x1xf32>,
    return
  }
}

</mosaic_0001>

<bundles_post_ra>
// kernel: _forward.1
= control target key start
LH: loop header
LB: loop body
LE: loop exit
PB: predicated region body
PF: predicated region fallthrough
CT: control target
= control target key end

     0   :  { %7 = vsyncpa [#allocation3], 0  ;;  %s2384_s9 = smov [#allocation2]   ;;  %s2942_s0 = inlined_call_operand.vmem [shape: f32[2,128], index: 0, kind: input, shape index: {}]   ;;  %s2943_s1 = inlined_call_operand.hbm [shape: f32[264,128], index: 1, kind: input, shape index: {}]   ;;  %s2944_s2 = inlined_call_operand.vmem [shape: f32[2,1], index: 2, kind: output, shape index: {}]  }
   0x1   :  { %s15_s10 = sshll.u32 %s2384_s9, 4  ;;  %s2360_s13 = scalar_lea.hbm %s2943_s1, 4224  ;;  %s16_s10 = int_to_ptr.vmem [resolvable:$true] %s15_s10 }
   0x2   :  { %p2361_p0 = scmp.ne.s32.totalorder %s2943_s1, %s2360_s13  ;;  %p2364_p1 = scmp.lt.u32.totalorder %s2360_s13, %s2943_s1 }
   0x4   :  { %p2366_p2 = pnand %p2364_p1, %p2361_p0 }
   0x6   :  { %2369 = shalt.err (!%p2366_p2)
}
   0x7   :  { %s2370_s18 = scalar_lea.vmem %s16_s10, 4224  ;;  %p2375_p4 = scmp.lt.s32.totalorder %s16_s10, %s16_s10 }
   0x8   :  { %p2371_p3 = scmp.ne.s32.totalorder %s16_s10, %s2370_s18  ;;  %p2376_p5 = scmp.lt.s32.totalorder %s2370_s18, %s2370_s18 }
   0xa   :  { %p2377_p6 = por %p2376_p5, %p2375_p4 }
   0xc   :  { %p2378_p7 = pnand %p2377_p6, %p2371_p3 }
   0xe   :  { %2381 = shalt.err (!%p2378_p7)
}
   0xf   :  { %s2385_s19 = smov 128   ;;  %s2386_s20 = smov 8  }
  0x10   :  { %21 = dma.hbm_to_vmem [thread:$0]  %s2943_s1, 4224, %s16_s10, [#allocation3], %s2385_s19, %s2385_s19, %s2386_s20  }
  0x11   :  { %2382 = dma.done.wait [#allocation3], 4224  }
  0x12   :  { %2383 = vsyncadd [#allocation3], 4294963072  ;;  %v2387_v0 = vmov 0.0|0.0   ;;  %vm2388_vm0 = vmmov 0   ;;  %v2389_v1 = vmov 0.0   ;;  %v25_v2 = vld [vmem:[#allocation2] sm:$0xff] }
  0x13   :  { %2051 = vmatprep.subr.bf16.mxu0 %v2387_v0  ;;  %1663 = vmatprep.mubr.msk.f32.mxu0 %vm2388_vm0, %v2389_v1  ;;  %v26_v3 = vld [vmem:[#allocation2 + $0x8] sm:$0xff]  ;;  %v27_v4 = vld [vmem:[#allocation2 + $0x10] sm:$0xff]  ;;  %v68_v5 = vand.u32 4294901760, %v25_v2  ;;  %v28_v7 = vld [vmem:[#allocation2 + $0x18] sm:$0xff]  ;;  %vm710_vm1 = vcmask 1041408   ;;  %vm735_vm3 = vcmask 1040384  }
  0x14   :  { %2195 = vmatprep.subr.bf16.mxu1 %v2387_v0  ;;  %1873 = vmatprep.mubr.msk.f32.mxu1 %vm2388_vm0, %v2389_v1  ;;  %v71_v6 = vand.u32 4294901760, %v26_v3  ;;  %v74_v8 = vand.u32 4294901760, %v27_v4  ;;  %v77_v9 = vand.u32 4294901760, %v28_v7  ;;  %v29_v10 = vld [vmem:[#allocation2 + $0x20] sm:$0xff]  ;;  %v30_v11 = vld [vmem:[#allocation2 + $0x28] sm:$0xff]  ;;  %v31_v16 = vld [vmem:[#allocation2 + $0x30] sm:$0xff] }
  0x15   :  { %v80_v14 = vand.u32 4294901760, %v29_v10  ;;  %v83_v15 = vand.u32 4294901760, %v30_v11  ;;  %v32_v17 = vld [vmem:[#allocation2 + $0x38] sm:$0xff]  ;;  %v86_v19 = vand.u32 4294901760, %v31_v16  ;;  %v33_v21 = vld [vmem:[#allocation2 + $0x40] sm:$0xff]  ;;  %v34_v22 = vld [vmem:[#allocation2 + $0x48] sm:$0xff]  ;;  %v2436_v24 = vsub.f32 %v25_v2, %v68_v5 }
  0x16   :  { %v2423_v12 = vpack.c.bf16 %v71_v6, %v68_v5  ;;  %v2426_v13 = vpack.c.bf16 %v77_v9, %v74_v8  ;;  %v89_v20 = vand.u32 4294901760, %v32_v17  ;;  %v62_v23 = vld [vmem:[%s2942_s0] sm:$0x3]  ;;  %v2438_v25 = vsub.f32 %v26_v3, %v71_v6  ;;  %v35_v29 = vld [vmem:[#allocation2 + $0x50] sm:$0xff]  ;;  %v36_v30 = vld [vmem:[#allocation2 + $0x58] sm:$0xff] }
  0x17   :  { %v2430_v18 = vpack.c.bf16 %v83_v15, %v80_v14  ;;  %v92_v27 = vand.u32 4294901760, %v33_v21  ;;  %v95_v28 = vand.u32 4294901760, %v34_v22  ;;  %v2444_v31 = vand.u32 4294901760, %v62_v23  ;;  %v37_v32 = vld [vmem:[#allocation2 + $0x60] sm:$0xff]  ;;  %v38_v35 = vld [vmem:[#allocation2 + $0x68] sm:$0xff]  ;;  %v39_v36 = vld [vmem:[#allocation2 + $0x70] sm:$0xff] }
  0x18   :  { %2053 = vmatpush3.bf16.msra.mxu0 %v2423_v12  ;;  %v2441_v26 = vpack.c.bf16 %v89_v20, %v86_v19  ;;  %v2446_v33 = vsub.f32 %v27_v4, %v74_v8  ;;  %v98_v34 = vand.u32 4294901760, %v35_v29  ;;  %v40_v37 = vld [vmem:[#allocation2 + $0x78] sm:$0xff]  ;;  %v101_v39 = vand.u32 4294901760, %v36_v30 }
  0x19   :  { %2054 = vmatprep.subr.bf16.mxu0 %v2387_v0  ;;  %v2449_v38 = vpack.c.bf16 %v95_v28, %v92_v27  ;;  %v161_v40 = vand.u32 4294901760, %v2436_v24  ;;  %v168_v41 = vand.u32 4294901760, %v2438_v25  ;;  %v2453_v42 = vsub.f32 %v28_v7, %v77_v9 }
  0x1a   :  { %v2455_v43 = vsub.f32 %v29_v10, %v80_v14  ;;  %v2457_v44 = vsub.f32 %v30_v11, %v83_v15  ;;  %v2461_v45 = vsub.f32 %v62_v23, %v2444_v31  ;;  %v104_v46 = vand.u32 4294901760, %v37_v32 }
  0x1b   :  { %v107_v47 = vand.u32 4294901760, %v38_v35  ;;  %v110_v48 = vand.u32 4294901760, %v39_v36  ;;  %v113_v49 = vand.u32 4294901760, %v40_v37  ;;  %v2463_v50 = vsub.f32 %v31_v16, %v86_v19 }
  0x1c   :  { %2056 = vmatpush3.bf16.msra.mxu0 %v2426_v13  ;;  %v2465_v51 = vsub.f32 %v32_v17, %v89_v20  ;;  %v2467_v52 = vsub.f32 %v33_v21, %v92_v27  ;;  %v175_v53 = vand.u32 4294901760, %v2446_v33  ;;  %v2471_v54 = vsub.f32 %v34_v22, %v95_v28 }
  0x1d   :  { %2057 = vmatprep.subr.bf16.mxu0 %v2387_v0  ;;  %v2473_v55 = vpack.c.bf16 %v101_v39, %v98_v34  ;;  %v162_v56 = vsub.f32 %v2436_v24, %v161_v40  ;;  %v169_v57 = vsub.f32 %v2438_v25, %v168_v41  ;;  %v2478_v58 = vsub.f32 %v35_v29, %v98_v34 }
  0x1e   :  { %v2480_v59 = vsub.f32 %v36_v30, %v101_v39  ;;  %v2482_v60 = vsub.f32 %v37_v32, %v104_v46  ;;  %v150_v61 = vand.u32 4294901760, %v2461_v45  ;;  %v2485_v62 = vpack.c.bf16 %v107_v47, %v104_v46 }
  0x1f   :  { %v2487_v63 = vsub.f32 %v38_v35, %v107_v47  ;;  %v2489_v2 = vpack.c.bf16 %v113_v49, %v110_v48  ;;  %v2491_v3 = vsub.f32 %v39_v36, %v110_v48  ;;  %v2493_v4 = vsub.f32 %v40_v37, %v113_v49 }
  0x20   :  { %2059 = vmatpush3.bf16.msra.mxu0 %v2430_v18  ;;  %v176_v5 = vsub.f32 %v2446_v33, %v175_v53  ;;  %v182_v6 = vand.u32 4294901760, %v2453_v42  ;;  %v189_v7 = vand.u32 4294901760, %v2455_v43  ;;  %v163_v8 = vand.u32 4294901760, %v162_v56 }
  0x21   :  { %2060 = vmatprep.subr.bf16.mxu0 %v2387_v0  ;;  %v170_v9 = vand.u32 4294901760, %v169_v57  ;;  %v196_v10 = vand.u32 4294901760, %v2457_v44  ;;  %v203_v11 = vand.u32 4294901760, %v2463_v50  ;;  %v151_v14 = vsub.f32 %v2461_v45, %v150_v61 }
  0x22   :  { %v210_v15 = vand.u32 4294901760, %v2465_v51  ;;  %v217_v16 = vand.u32 4294901760, %v2467_v52  ;;  %v224_v17 = vand.u32 4294901760, %v2471_v54  ;;  %v231_v19 = vand.u32 4294901760, %v2478_v58 }
  0x23   :  { %v238_v20 = vand.u32 4294901760, %v2480_v59  ;;  %v245_v21 = vand.u32 4294901760, %v2482_v60  ;;  %v252_v22 = vand.u32 4294901760, %v2487_v63  ;;  %v259_v23 = vand.u32 4294901760, %v2491_v3 }
  0x24   :  { %2062 = vmatpush3.bf16.msra.mxu0 %v2441_v26  ;;  %v266_v27 = vand.u32 4294901760, %v2493_v4  ;;  %v2514_v28 = vpack.c.bf16 %v168_v41, %v161_v40  ;;  %v2516_v29 = vpack.c.bf16 %v182_v6, %v175_v53  ;;  %v183_v30 = vsub.f32 %v2453_v42, %v182_v6 }
  0x25   :  { %2063 = vmatprep.subr.bf16.mxu0 %v2387_v0  ;;  %v2520_v32 = vpack.c.bf16 %v196_v10, %v189_v7  ;;  %v2522_v34 = vpack.c.bf16 %v210_v15, %v203_v11  ;;  %v2524_v35 = vpack.c.bf16 %v224_v17, %v217_v16  ;;  %v2527_v36 = vpack.c.bf16 %v238_v20, %v231_v19 }
  0x26   :  { %v2529_v37 = vpack.c.bf16 %v252_v22, %v245_v21  ;;  %v2531_v39 = vpack.c.bf16 %v266_v27, %v259_v23  ;;  %v152_v40 = vand.u32 4294901760, %v151_v14  ;;  %v177_v41 = vand.u32 4294901760, %v176_v5 }
  0x27   :  { %v2076_v46 = vpack.c.bf16 %v170_v9, %v163_v8  ;;  %v184_v47 = vand.u32 4294901760, %v183_v30  ;;  %v190_v48 = vsub.f32 %v2455_v43, %v189_v7  ;;  %v197_v49 = vsub.f32 %v2457_v44, %v196_v10 }
  0x28   :  { %2065 = vmatpush3.bf16.msra.mxu0 %v2449_v38  ;;  %v204_v53 = vsub.f32 %v2463_v50, %v203_v11  ;;  %v211_v14 = vsub.f32 %v2465_v51, %v210_v15  ;;  %v218_v5 = vsub.f32 %v2467_v52, %v217_v16  ;;  %v225_v10 = vsub.f32 %v2471_v54, %v224_v17 }
  0x29   :  { %2066 = vmatprep.subr.bf16.mxu0 %v2387_v0  ;;  %v2079_v56 = vpack.c.bf16 %v184_v47, %v177_v41  ;;  %v191_v57 = vand.u32 4294901760, %v190_v48  ;;  %v198_v6 = vand.u32 4294901760, %v197_v49  ;;  %v232_v15 = vsub.f32 %v2478_v58, %v231_v19 }
  0x2a   :  { %v205_v8 = vand.u32 4294901760, %v204_v53  ;;  %v212_v9 = vand.u32 4294901760, %v211_v14  ;;  %v219_v11 = vand.u32 4294901760, %v218_v5  ;;  %v239_v41 = vsub.f32 %v2480_v59, %v238_v20  ;;  %v43_v5 = vld [vmem:[#allocation2 + $0x90] sm:$0xff] }
  0x2b   :  { %v2082_v7 = vpack.c.bf16 %v198_v6, %v191_v57  ;;  %v246_v16 = vsub.f32 %v2482_v60, %v245_v21  ;;  %v233_v47 = vand.u32 4294901760, %v232_v15  ;;  %v253_v17 = vsub.f32 %v2487_v63, %v252_v22 }
  0x2c   :  { %2068 = vmatpush3.bf16.msra.mxu0 %v2473_v55  ;;  %v2085_v30 = vpack.c.bf16 %v212_v9, %v205_v8  ;;  %v240_v48 = vand.u32 4294901760, %v239_v41  ;;  %v260_v19 = vsub.f32 %v2491_v3, %v259_v23  ;;  %v267_v20 = vsub.f32 %v2493_v4, %v266_v27  ;;  %v41_v23 = vld [vmem:[#allocation2 + $0x80] sm:$0xff]  ;;  %v42_v27 = vld [vmem:[#allocation2 + $0x88] sm:$0xff]  ;;  %v47_v41 = vld [vmem:[#allocation2 + $0xb0] sm:$0xff] }
  0x2d   :  { %2069 = vmatprep.subr.bf16.mxu0 %v2387_v0  ;;  %v247_v49 = vand.u32 4294901760, %v246_v16  ;;  %v2100_v14 = vpack.c.bf16 %v2438_v25, %v2436_v24  ;;  %v754_v8 = vand.u32 4294901760, %v41_v23  ;;  %v757_v9 = vand.u32 4294901760, %v42_v27  ;;  %v46_v24 = vld [vmem:[#allocation2 + $0xa8] sm:$0xff]  ;;  %v48_v16 = vld [vmem:[#allocation2 + $0xb8] sm:$0xff] }
  0x2e   :  { %v2091_v53 = vpack.c.bf16 %v240_v48, %v233_v47  ;;  %v261_v57 = vand.u32 4294901760, %v260_v19  ;;  %v268_v6 = vand.u32 4294901760, %v267_v20  ;;  %v769_v15 = vand.u32 4294901760, %v46_v24 }
  0x2f   :  { %v2567_v47 = vsub.f32 %v41_v23, %v754_v8  ;;  %v2106_v48 = vpack.c.bf16 %v2457_v44, %v2455_v43  ;;  %v772_v19 = vand.u32 4294901760, %v47_v41  ;;  %v775_v20 = vand.u32 4294901760, %v48_v16 }
  0x30   :  { %2071 = vmatpush3.bf16.msra.mxu0 %v2485_v62  ;;  %v2097_v22 = vpack.c.bf16 %v268_v6, %v261_v57  ;;  %v2109_v44 = vpack.c.bf16 %v2465_v51, %v2463_v50  ;;  %v2112_v6 = vpack.c.bf16 %v2471_v54, %v2467_v52  ;;  %v2115_v50 = vpack.c.bf16 %v2480_v59, %v2478_v58  ;;  %v52_v54 = vld [vmem:[#allocation2 + $0xd8] sm:$0xff] }
  0x31   :  { %2072 = vmatprep.subr.bf16.mxu0 %v2387_v0  ;;  %v2588_v43 = vsub.f32 %v48_v16, %v775_v20  ;;  %v2118_v51 = vpack.c.bf16 %v2487_v63, %v2482_v60  ;;  %v2121_v52 = vpack.c.bf16 %v2493_v4, %v2491_v3  ;;  %v787_v58 = vand.u32 4294901760, %v52_v54  ;;  %v53_v60 = vld [vmem:[#allocation2 + $0xe0] sm:$0xff]  ;;  %v56_v3 = vld [vmem:[#allocation2 + $0xf8] sm:$0xff] }
  0x32   :  { %vm1417_vm5 = vcmask 1024  }
  0x33   :  { %v896_v16 = vand.u32 4294901760, %v2588_v43 }
  0x34   :  { %2074 = vmatpush3.bf16.msra.mxu0 %v2489_v2 }
  0x35   :  { %2075 = vmatprep.subr.bf16.mxu0 %v2387_v0 }
  0x37   :  { %1664 = vmatmul.mubr.f32.vlgmr.msra.gmra.mrb[0].mxu0 %v152_v40  ;;  %v226_v40 = vand.u32 4294901760, %v225_v10  ;;  %v44_v10 = vld [vmem:[#allocation2 + $0x98] sm:$0xff] }
  0x38   :  { %2077 = vmatpush3.bf16.msra.mxu0 %v2076_v46  ;;  %1698 = vmatprep.mubr.msk.f32.mxu0 %vm2388_vm0, %v2389_v1  ;;  %v763_v25 = vand.u32 4294901760, %v44_v10 }
  0x39   :  { %2078 = vmatprep.subr.bf16.mxu0 %v2387_v0  ;;  %v2088_v46 = vpack.c.bf16 %v226_v40, %v219_v11  ;;  %v760_v11 = vand.u32 4294901760, %v43_v5 }
  0x3c   :  { %2080 = vmatpush3.bf16.msra.mxu0 %v2079_v56  ;;  %v254_v56 = vand.u32 4294901760, %v253_v17  ;;  %v2575_v17 = vsub.f32 %v44_v10, %v763_v25 }
  0x3d   :  { %2081 = vmatprep.subr.bf16.mxu0 %v2387_v0 }
  0x3e   :  { %v2094_v21 = vpack.c.bf16 %v254_v56, %v247_v49  ;;  %v2582_v56 = vsub.f32 %v46_v24, %v769_v15  ;;  %v868_v23 = vand.u32 4294901760, %v2575_v17 }
  0x40   :  { %2083 = vmatpush3.bf16.msra.mxu0 %v2082_v7  ;;  %v2103_v7 = vpack.c.bf16 %v2453_v42, %v2446_v33  ;;  %v2569_v33 = vsub.f32 %v42_v27, %v757_v9  ;;  %v2571_v42 = vsub.f32 %v43_v5, %v760_v11 }
  0x41   :  { %2084 = vmatprep.subr.bf16.mxu0 %v2387_v0 }
  0x44   :  { %2086 = vmatpush3.bf16.msra.mxu0 %v2085_v30  ;;  %v45_v30 = vld [vmem:[#allocation2 + $0xa0] sm:$0xff] }
  0x45   :  { %2087 = vmatprep.subr.bf16.mxu0 %v2387_v0  ;;  %v766_v40 = vand.u32 4294901760, %v45_v30 }
  0x47   :  { %v2577_v49 = vsub.f32 %v45_v30, %v766_v40  ;;  %v2593_v57 = vpack.c.bf16 %v769_v15, %v766_v40 }
  0x48   :  { %2089 = vmatpush3.bf16.msra.mxu0 %v2088_v46  ;;  %v2565_v46 = vpack.c.bf16 %v757_v9, %v754_v8 }
  0x49   :  { %2090 = vmatprep.subr.bf16.mxu0 %v2387_v0  ;;  %v875_v10 = vand.u32 4294901760, %v2577_v49 }
  0x4a   :  { %2197 = vmatpush3.bf16.msra.mxu1 %v2565_v46 }
  0x4b   :  { %2198 = vmatprep.subr.bf16.mxu1 %v2387_v0  ;;  %v876_v24 = vsub.f32 %v2577_v49, %v875_v10 }
  0x4c   :  { %2092 = vmatpush3.bf16.msra.mxu0 %v2091_v53  ;;  %v2580_v53 = vpack.c.bf16 %v763_v25, %v760_v11  ;;  %v882_v11 = vand.u32 4294901760, %v2582_v56 }
  0x4d   :  { %2093 = vmatprep.subr.bf16.mxu0 %v2387_v0  ;;  %v877_v40 = vand.u32 4294901760, %v876_v24 }
  0x4e   :  { %2200 = vmatpush3.bf16.msra.mxu1 %v2580_v53  ;;  %v883_v25 = vsub.f32 %v2582_v56, %v882_v11 }
  0x4f   :  { %2201 = vmatprep.subr.bf16.mxu1 %v2387_v0 }
  0x50   :  { %2095 = vmatpush3.bf16.msra.mxu0 %v2094_v21  ;;  %v2586_v21 = vsub.f32 %v47_v41, %v772_v19  ;;  %v884_v15 = vand.u32 4294901760, %v883_v25 }
  0x51   :  { %2096 = vmatprep.subr.bf16.mxu0 %v2387_v0 }
  0x52   :  { %2203 = vmatpush3.bf16.msra.mxu1 %v2593_v57  ;;  %v889_v41 = vand.u32 4294901760, %v2586_v21 }
  0x53   :  { %2204 = vmatprep.subr.bf16.mxu1 %v2387_v0 }
  0x54   :  { %2098 = vmatpush3.bf16.msra.mxu0 %v2097_v22  ;;  %v2600_v22 = vpack.c.bf16 %v775_v20, %v772_v19  ;;  %v2724_v20 = vpack.c.bf16 %v884_v15, %v877_v40 }
  0x55   :  { %2099 = vmatprep.subr.bf16.mxu0 %v2387_v0 }
  0x56   :  { %2206 = vmatpush3.bf16.msra.mxu1 %v2600_v22 }
  0x57   :  { %1699 = vmatmul.mubr.f32.vlgmr.msra.gmra.mrb[0].mxu0 %v2444_v31  ;;  %2207 = vmatprep.subr.bf16.mxu1 %v2387_v0 }
  0x58   :  { %2101 = vmatpush3.bf16.msra.mxu0 %v2100_v14  ;;  %1733 = vmatprep.mubr.msk.f32.mxu0 %vm2388_vm0, %v2389_v1  ;;  %v861_v14 = vand.u32 4294901760, %v2571_v42 }
  0x59   :  { %2102 = vmatprep.subr.bf16.mxu0 %v2387_v0 }
  0x5a   :  { %v862_v5 = vsub.f32 %v2571_v42, %v861_v14 }
  0x5c   :  { %2104 = vmatpush3.bf16.msra.mxu0 %v2103_v7  ;;  %v869_v7 = vsub.f32 %v2575_v17, %v868_v23  ;;  %v863_v8 = vand.u32 4294901760, %v862_v5 }
  0x5d   :  { %2105 = vmatprep.subr.bf16.mxu0 %v2387_v0 }
  0x5e   :  { %v870_v9 = vand.u32 4294901760, %v869_v7 }
  0x60   :  { %2107 = vmatpush3.bf16.msra.mxu0 %v2106_v48  ;;  %v2710_v30 = vpack.c.bf16 %v870_v9, %v863_v8 }
  0x61   :  { %2108 = vmatprep.subr.bf16.mxu0 %v2387_v0 }
  0x64   :  { %2110 = vmatpush3.bf16.msra.mxu0 %v2109_v44  ;;  %v890_v44 = vsub.f32 %v2586_v21, %v889_v41 }
  0x65   :  { %2111 = vmatprep.subr.bf16.mxu0 %v2387_v0 }
  0x68   :  { %2113 = vmatpush3.bf16.msra.mxu0 %v2112_v6  ;;  %v897_v6 = vsub.f32 %v2588_v43, %v896_v16 }
  0x69   :  { %2114 = vmatprep.subr.bf16.mxu0 %v2387_v0 }
  0x6c   :  { %2116 = vmatpush3.bf16.msra.mxu0 %v2115_v50  ;;  %v891_v50 = vand.u32 4294901760, %v890_v44 }
  0x6d   :  { %2117 = vmatprep.subr.bf16.mxu0 %v2387_v0 }
  0x70   :  { %2119 = vmatpush3.bf16.msra.mxu0 %v2118_v51  ;;  %v898_v51 = vand.u32 4294901760, %v897_v6 }
  0x71   :  { %2120 = vmatprep.subr.bf16.mxu0 %v2387_v0 }
  0x74   :  { %2122 = vmatpush3.bf16.msra.mxu0 %v2121_v52 }
  0x75   :  { %2123 = vmatprep.subr.bf16.mxu0 %v2387_v0 }
  0x77   :  { %1734 = vmatmul.mubr.f32.vlgmr.msra.gmra.mrb[0].mxu0 %v2461_v45 }
  0x78   :  { %2125 = vmatpush3.bf16.msra.mxu0 %v2423_v12  ;;  %1768 = vmatprep.mubr.msk.f32.mxu0 %vm2388_vm0, %v2389_v1 }
  0x79   :  { %2126 = vmatprep.subr.bf16.mxu0 %v2387_v0 }
  0x7c   :  { %2128 = vmatpush3.bf16.msra.mxu0 %v2426_v13 }
  0x7d   :  { %2129 = vmatprep.subr.bf16.mxu0 %v2387_v0 }
  0x80   :  { %2131 = vmatpush3.bf16.msra.mxu0 %v2430_v18 }
  0x81   :  { %2132 = vmatprep.subr.bf16.mxu0 %v2387_v0 }
  0x84   :  { %2134 = vmatpush3.bf16.msra.mxu0 %v2441_v26 }
  0x85   :  { %2135 = vmatprep.subr.bf16.mxu0 %v2387_v0 }
  0x88   :  { %2137 = vmatpush3.bf16.msra.mxu0 %v2449_v38 }
  0x89   :  { %2138 = vmatprep.subr.bf16.mxu0 %v2387_v0 }
  0x8c   :  { %2140 = vmatpush3.bf16.msra.mxu0 %v2473_v55 }
  0x8d   :  { %2141 = vmatprep.subr.bf16.mxu0 %v2387_v0 }
  0x90   :  { %2143 = vmatpush3.bf16.msra.mxu0 %v2485_v62 }
  0x91   :  { %2144 = vmatprep.subr.bf16.mxu0 %v2387_v0 }
  0x94   :  { %2146 = vmatpush3.bf16.msra.mxu0 %v2489_v2 }
  0x95   :  { %2147 = vmatprep.subr.bf16.mxu0 %v2387_v0 }
  0x97   :  { %1769 = vmatmul.mubr.f32.vlgmr.msra.gmra.mrb[0].mxu0 %v150_v61  ;;  %v54_v61 = vld [vmem:[#allocation2 + $0xe8] sm:$0xff] }
  0x98   :  { %2149 = vmatpush3.bf16.msra.mxu0 %v2514_v28  ;;  %1803 = vmatprep.mubr.msk.f32.mxu0 %vm2388_vm0, %v2389_v1  ;;  %v799_v28 = vand.u32 4294901760, %v56_v3 }
  0x99   :  { %2150 = vmatprep.subr.bf16.mxu0 %v2387_v0 }
  0x9c   :  { %2152 = vmatpush3.bf16.msra.mxu0 %v2516_v29  ;;  %v847_v29 = vand.u32 4294901760, %v2567_v47 }
  0x9d   :  { %2153 = vmatprep.subr.bf16.mxu0 %v2387_v0 }
  0xa0   :  { %2155 = vmatpush3.bf16.msra.mxu0 %v2520_v32  ;;  %v854_v32 = vand.u32 4294901760, %v2569_v33 }
  0xa1   :  { %2156 = vmatprep.subr.bf16.mxu0 %v2387_v0 }
  0xa4   :  { %2158 = vmatpush3.bf16.msra.mxu0 %v2522_v34 }
  0xa5   :  { %2159 = vmatprep.subr.bf16.mxu0 %v2387_v0 }
  0xa8   :  { %2161 = vmatpush3.bf16.msra.mxu0 %v2524_v35  ;;  %v848_v35 = vsub.f32 %v2567_v47, %v847_v29 }
  0xa9   :  { %2162 = vmatprep.subr.bf16.mxu0 %v2387_v0 }
  0xac   :  { %2164 = vmatpush3.bf16.msra.mxu0 %v2527_v36  ;;  %v855_v36 = vsub.f32 %v2569_v33, %v854_v32 }
  0xad   :  { %2165 = vmatprep.subr.bf16.mxu0 %v2387_v0 }
  0xb0   :  { %2167 = vmatpush3.bf16.msra.mxu0 %v2529_v37  ;;  %v849_v37 = vand.u32 4294901760, %v848_v35 }
  0xb1   :  { %2168 = vmatprep.subr.bf16.mxu0 %v2387_v0 }
  0xb4   :  { %2170 = vmatpush3.bf16.msra.mxu0 %v2531_v39  ;;  %v856_v39 = vand.u32 4294901760, %v855_v36 }
  0xb5   :  { %2171 = vmatprep.subr.bf16.mxu0 %v2387_v0 }
  0xb6   :  { %v2700_v27 = vpack.c.bf16 %v856_v39, %v849_v37 }
  0xb7   :  { %1804 = vmatmul.mubr.f32.vlgmr.msra.gmra.mrb[0].mxu0 %v2444_v31 }
  0xb8   :  { %2173 = vmatpush3.bf16.msra.mxu0 %v2423_v12  ;;  %1838 = vmatprep.mubr.msk.f32.mxu0 %vm2388_vm0, %v2389_v1  ;;  %v49_v12 = vld [vmem:[#allocation2 + $0xc0] sm:$0xff] }
  0xb9   :  { %2174 = vmatprep.subr.bf16.mxu0 %v2387_v0 }
  0xbc   :  { %2176 = vmatpush3.bf16.msra.mxu0 %v2426_v13  ;;  %v50_v13 = vld [vmem:[#allocation2 + $0xc8] sm:$0xff] }
  0xbd   :  { %2177 = vmatprep.subr.bf16.mxu0 %v2387_v0 }
  0xc0   :  { %2179 = vmatpush3.bf16.msra.mxu0 %v2430_v18  ;;  %v778_v18 = vand.u32 4294901760, %v49_v12 }
  0xc1   :  { %2180 = vmatprep.subr.bf16.mxu0 %v2387_v0 }
  0xc2   :  { %v2720_v48 = vsub.f32 %v49_v12, %v778_v18 }
  0xc4   :  { %2182 = vmatpush3.bf16.msra.mxu0 %v2441_v26  ;;  %v781_v26 = vand.u32 4294901760, %v50_v13  ;;  %v2952_v52 = vand.u32 4294901760, %v2720_v48 }
  0xc5   :  { %2183 = vmatprep.subr.bf16.mxu0 %v2387_v0 }
  0xc6   :  { %v2674_v45 = vpack.c.bf16 %v781_v26, %v778_v18  ;;  %v2722_v19 = vsub.f32 %v50_v13, %v781_v26  ;;  %v2736_v13 = vsub.f32 %v52_v54, %v787_v58  ;;  %v2738_v18 = vpack.c.bf16 %v898_v51, %v891_v50 }
  0xc7   :  { %v904_v26 = vsub.f32 %v2720_v48, %v2952_v52 }
  0xc8   :  { %2185 = vmatpush3.bf16.msra.mxu0 %v2449_v38  ;;  %v51_v38 = vld [vmem:[#allocation2 + $0xd0] sm:$0xff]  ;;  %2209 = vmatpush3.bf16.msra.mxu1 %v2674_v45  ;;  %v2951_v35 = vand.u32 4294901760, %v2722_v19  ;;  %v2949_v7 = vand.u32 4294901760, %v2736_v13 }
  0xc9   :  { %2186 = vmatprep.subr.bf16.mxu0 %v2387_v0  ;;  %2210 = vmatprep.subr.bf16.mxu1 %v2387_v0  ;;  %v905_v37 = vand.u32 4294901760, %v904_v26 }
  0xca   :  { %v911_v36 = vsub.f32 %v2722_v19, %v2951_v35  ;;  %v925_v8 = vsub.f32 %v2736_v13, %v2949_v7 }
  0xcc   :  { %2188 = vmatpush3.bf16.msra.mxu0 %v2473_v55  ;;  %v784_v55 = vand.u32 4294901760, %v51_v38  ;;  %v912_v39 = vand.u32 4294901760, %v911_v36  ;;  %v926_v24 = vand.u32 4294901760, %v925_v8  ;;  %v2253_v8 = vpack.c.bf16 %v2588_v43, %v2586_v21 }
  0xcd   :  { %2189 = vmatprep.subr.bf16.mxu0 %v2387_v0 }
  0xce   :  { %v2678_v59 = vpack.c.bf16 %v787_v58, %v784_v55  ;;  %v2734_v12 = vsub.f32 %v51_v38, %v784_v55  ;;  %v2752_v55 = vpack.c.bf16 %v912_v39, %v905_v37  ;;  %v2244_v37 = vpack.c.bf16 %v2569_v33, %v2567_v47 }
  0xcf   :  { %v2247_v39 = vpack.c.bf16 %v2575_v17, %v2571_v42  ;;  %v2298_v47 = vpack.c.bf16 %v882_v11, %v875_v10  ;;  %v2301_v33 = vpack.c.bf16 %v896_v16, %v889_v41  ;;  %v2953_v42 = vand.u32 4294901760, %v2720_v48 }
  0xd0   :  { %2191 = vmatpush3.bf16.msra.mxu0 %v2485_v62  ;;  %2212 = vmatpush3.bf16.msra.mxu1 %v2678_v59  ;;  %v793_v62 = vand.u32 4294901760, %v54_v61  ;;  %v2950_v5 = vand.u32 4294901760, %v2734_v12  ;;  %v2954_v17 = vand.u32 4294901760, %v2722_v19 }
  0xd1   :  { %2192 = vmatprep.subr.bf16.mxu0 %v2387_v0  ;;  %2213 = vmatprep.subr.bf16.mxu1 %v2387_v0 }
  0xd2   :  { %v2750_v54 = vsub.f32 %v54_v61, %v793_v62  ;;  %v918_v58 = vsub.f32 %v2734_v12, %v2950_v5  ;;  %v2764_v61 = vsub.f32 %v56_v3, %v799_v28 }
  0xd4   :  { %2194 = vmatpush3.bf16.msra.mxu0 %v2489_v2  ;;  %v55_v2 = vld [vmem:[#allocation2 + $0xf0] sm:$0xff]  ;;  %v919_v9 = vand.u32 4294901760, %v918_v58  ;;  %v2947_v40 = vand.u32 4294901760, %v2750_v54  ;;  %v2945_v51 = vand.u32 4294901760, %v2764_v61  ;;  %v2250_v58 = vpack.c.bf16 %v2582_v56, %v2577_v49 }
  0xd5   :  { %v796_v4 = vand.u32 4294901760, %v55_v2  ;;  %v2955_v49 = vand.u32 4294901760, %v2734_v12  ;;  %v2956_v56 = vand.u32 4294901760, %v2736_v13  ;;  %v2958_v43 = vand.u32 4294901760, %v2750_v54 }
  0xd6   :  { %v939_v15 = vsub.f32 %v2750_v54, %v2947_v40  ;;  %v953_v3 = vsub.f32 %v2764_v61, %v2945_v51  ;;  %v2960_v10 = vand.u32 4294901760, %v2764_v61 }
  0xd7   :  { %1839 = vmatmul.mubr.f32.vlgmr.msra.gmra.mrb[0].mxu0 %v2444_v31  ;;  %v790_v31 = vand.u32 4294901760, %v53_v60  ;;  %v2688_v34 = vpack.c.bf16 %v799_v28, %v796_v4 }
  0xd8   :  { %v940_v6 = vand.u32 4294901760, %v939_v15  ;;  %v954_v28 = vand.u32 4294901760, %v953_v3 }
  0xd9   :  { %v2682_v63 = vpack.c.bf16 %v793_v62, %v790_v31  ;;  %v2748_v38 = vsub.f32 %v53_v60, %v790_v31  ;;  %v2762_v60 = vsub.f32 %v55_v2, %v796_v4  ;;  %v2235_v31 = vpack.c.bf16 %v926_v24, %v919_v9 }
  0xda   :  { %v2256_v9 = vpack.c.bf16 %v2722_v19, %v2720_v48  ;;  %v2259_v24 = vpack.c.bf16 %v2736_v13, %v2734_v12  ;;  %v749_v48 = vlaneseq }
  0xdb   :  { %2215 = vmatpush3.bf16.msra.mxu1 %v2682_v63  ;;  %v2948_v25 = vand.u32 4294901760, %v2748_v38  ;;  %v2946_v50 = vand.u32 4294901760, %v2762_v60  ;;  %v2265_v15 = vpack.c.bf16 %v2764_v61, %v2762_v60  ;;  %v2957_v21 = vand.u32 4294901760, %v2748_v38 }
  0xdc   :  { %2216 = vmatprep.subr.bf16.mxu1 %v2387_v0  ;;  %v750_v19 = vshrl.u32 %v749_v48, 7 }
  0xdd   :  { %v932_v62 = vsub.f32 %v2748_v38, %v2948_v25  ;;  %v946_v2 = vsub.f32 %v2762_v60, %v2946_v50 }
  0xde   :  { %v751_v13 = vsub.s32 0, %v750_v19 }
  0xdf   :  { %2218 = vmatpush3.bf16.msra.mxu1 %v2688_v34  ;;  %v933_v44 = vand.u32 4294901760, %v932_v62  ;;  %v947_v4 = vand.u32 4294901760, %v946_v2  ;;  %v2262_v62 = vpack.c.bf16 %v2750_v54, %v2748_v38 }
  0xe0   :  { %2219 = vmatprep.subr.bf16.mxu1 %v2387_v0 }
  0xe1   :  { %v2238_v26 = vpack.c.bf16 %v940_v6, %v933_v44  ;;  %v2241_v36 = vpack.c.bf16 %v954_v28, %v947_v4  ;;  %v1424_v44 = vld [vmem:[#allocation2 + $0x101] ss:$0 sm:$0xff] }
 0x1aa   :  { %v704_v6 = vpop.f32.mrb[0].mxu0 }
 0x1ab   :  { %v2339_v2 = vadd.f32 %v1424_v44, %v704_v6  ;;  %v1840_v3 = vpop.f32.mrb[1].mxu0 }
 0x1ad   :  { %v708_v4 = vmul.f32 0.2, %v2339_v2 }
 0x1af   :  { %v709_v28 = vmax.f32 %v2339_v2, %v708_v4 }
 0x1b1   :  { %v711_v51 = vsel %vm710_vm1, %v709_v28, 0.0  ;;  %v2797_v50 = vand.u32 4294901760, %v709_v28 }
 0x1b2   :  { %v712_v40 = vrot.slane %v711_v51, 4 }
 0x1b3   :  { %v2800_v25 = vsub.f32 %v709_v28, %v2797_v50 }
 0x1b4   :  { %v713_v7 = vadd.f32 %v712_v40, %v711_v51 }
 0x1b5   :  { %v836_v5 = vand.u32 4294901760, %v2800_v25 }
 0x1b6   :  { %v714_v35 = vrot.slane %v713_v7, 2 }
 0x1b7   :  { %v837_v44 = vsub.f32 %v2800_v25, %v836_v5 }
 0x1b8   :  { %v715_v6 = vadd.f32 %v714_v35, %v713_v7 }
 0x1b9   :  { %v838_v3 = vand.u32 4294901760, %v837_v44 }
 0x1ba   :  { %v716_v52 = vrot.slane %v715_v6, 1 }
 0x1bb   :  { %1874 = vmatmul.mubr.f32.vlgmr.msra.gmra.mrb[0].mxu1 %v838_v3 }
 0x1bc   :  { %v717_v2 = vadd.f32 %v716_v52, %v715_v6  ;;  %2221 = vmatpush3.bf16.msra.mxu1 %v2700_v27  ;;  %1908 = vmatprep.mubr.msk.f32.mxu1 %vm2388_vm0, %v2389_v1 }
 0x1bd   :  { %2222 = vmatprep.subr.bf16.mxu1 %v2387_v0 }
 0x1be   :  { %v718_v40 = vmul.f32 0.5, %v717_v2 }
 0x1c0   :  { %v719_v51 = vsub.f32 %v709_v28, %v718_v40  ;;  %2224 = vmatpush3.bf16.msra.mxu1 %v2710_v30  ;;  %v1425_v40 = vld [vmem:[#allocation2 + $0x102] ss:$0 sm:$0xff] }
 0x1c1   :  { %2225 = vmatprep.subr.bf16.mxu1 %v2387_v0 }
 0x1c2   :  { %v720_v4 = vmul.f32 %v719_v51, %v719_v51 }
 0x1c4   :  { %v721_v35 = vsel %vm710_vm1, %v720_v4, 0.0  ;;  %2227 = vmatpush3.bf16.msra.mxu1 %v2724_v20 }
 0x1c5   :  { %v722_v7 = vrot.slane %v721_v35, 4  ;;  %2228 = vmatprep.subr.bf16.mxu1 %v2387_v0 }
 0x1c7   :  { %v723_v27 = vadd.f32 %v722_v7, %v721_v35 }
 0x1c8   :  { %2230 = vmatpush3.bf16.msra.mxu1 %v2738_v18 }
 0x1c9   :  { %v724_v52 = vrot.slane %v723_v27, 2  ;;  %2231 = vmatprep.subr.bf16.mxu1 %v2387_v0 }
 0x1cb   :  { %v725_v44 = vadd.f32 %v724_v52, %v723_v27  ;;  %v1426_v52 = vld [vmem:[#allocation2 + $0x103] ss:$0 sm:$0xff] }
 0x1cc   :  { %2233 = vmatpush3.bf16.msra.mxu1 %v2752_v55 }
 0x1cd   :  { %v726_v30 = vrot.slane %v725_v44, 1  ;;  %2234 = vmatprep.subr.bf16.mxu1 %v2387_v0 }
 0x1cf   :  { %v727_v28 = vadd.f32 %v726_v30, %v725_v44 }
 0x1d0   :  { %2236 = vmatpush3.bf16.msra.mxu1 %v2235_v31 }
 0x1d1   :  { %2237 = vmatprep.subr.bf16.mxu1 %v2387_v0  ;;  %2358 = vrsqrt.f32 %v727_v28  ;;  %vm730_vm2 = vcmp.eq.f32.partialorder %v727_v28, inf  ;;  %v733_v55 = vand.u32 2147483648, %v727_v28  ;;  %vm732_vm4 = vcmp.eq.f32.partialorder %v727_v28, 0.0 }
 0x1d4   :  { %2239 = vmatpush3.bf16.msra.mxu1 %v2238_v26 }
 0x1d5   :  { %2240 = vmatprep.subr.bf16.mxu1 %v2387_v0 }
 0x1d8   :  { %2242 = vmatpush3.bf16.msra.mxu1 %v2241_v36 }
 0x1d9   :  { %2243 = vmatprep.subr.bf16.mxu1 %v2387_v0 }
 0x1db   :  { %v2359_v20 = vpop.eup %2358  ;;  %1909 = vmatmul.mubr.f32.vlgmr.msra.gmra.mrb[2].mxu1 %v2797_v50 }
 0x1dc   :  { %2245 = vmatpush3.bf16.msra.mxu1 %v2244_v37  ;;  %v729_v18 = vmul.f32 %v2359_v20, %v727_v28  ;;  %1943 = vmatprep.mubr.msk.f32.mxu1 %vm2388_vm0, %v2389_v1  ;;  %v2292_v37 = vpack.c.bf16 %v854_v32, %v847_v29  ;;  %v2304_v29 = vpack.c.bf16 %v2954_v17, %v2953_v42 }
 0x1dd   :  { %2246 = vmatprep.subr.bf16.mxu1 %v2387_v0  ;;  %v2307_v32 = vpack.c.bf16 %v2956_v56, %v2955_v49 }
 0x1de   :  { %v731_v31 = vsel %vm730_vm2, %v727_v28, %v729_v18 }
 0x1df   :  { %v734_v26 = vsel %vm732_vm4, %v733_v55, %v731_v31 }
 0x1e0   :  { %2248 = vmatpush3.bf16.msra.mxu1 %v2247_v39  ;;  %v736_v36 = vsel %vm735_vm3, %v734_v26, 0.0  ;;  %v2295_v39 = vpack.c.bf16 %v868_v23, %v861_v14  ;;  %v2310_v14 = vpack.c.bf16 %v2958_v43, %v2957_v21  ;;  %v2959_v23 = vand.u32 4294901760, %v2762_v60 }
 0x1e1   :  { %737 = vadd.xlane.f32.xlu0 %v736_v36  ;;  %2249 = vmatprep.subr.bf16.mxu1 %v2387_v0 }
 0x1e2   :  { %v2313_v11 = vpack.c.bf16 %v2960_v10, %v2959_v23 }
 0x1e4   :  { %2251 = vmatpush3.bf16.msra.mxu1 %v2250_v58 }
 0x1e5   :  { %2252 = vmatprep.subr.bf16.mxu1 %v2387_v0 }
 0x1e8   :  { %2254 = vmatpush3.bf16.msra.mxu1 %v2253_v8 }
 0x1e9   :  { %2255 = vmatprep.subr.bf16.mxu1 %v2387_v0 }
 0x1ec   :  { %2257 = vmatpush3.bf16.msra.mxu1 %v2256_v9 }
 0x1ed   :  { %2258 = vmatprep.subr.bf16.mxu1 %v2387_v0 }
 0x1f0   :  { %2260 = vmatpush3.bf16.msra.mxu1 %v2259_v24 }
 0x1f1   :  { %2261 = vmatprep.subr.bf16.mxu1 %v2387_v0 }
 0x1f4   :  { %2263 = vmatpush3.bf16.msra.mxu1 %v2262_v62 }
 0x1f5   :  { %2264 = vmatprep.subr.bf16.mxu1 %v2387_v0 }
 0x1f8   :  { %2266 = vmatpush3.bf16.msra.mxu1 %v2265_v15 }
 0x1f9   :  { %2267 = vmatprep.subr.bf16.mxu1 %v2387_v0 }
 0x1fb   :  { %1944 = vmatmul.mubr.f32.vlgmr.msra.gmra.mrb[4].mxu1 %v2800_v25  ;;  %v61_v25 = vld [vmem:[#allocation2 + $0x104] sm:$0x1] }
 0x1fc   :  { %2269 = vmatpush3.bf16.msra.mxu1 %v2565_v46  ;;  %1978 = vmatprep.mubr.msk.f32.mxu1 %vm2388_vm0, %v2389_v1  ;;  %v1409_v61 = vsel %vm735_vm3, %v61_v25, 0.0 }
 0x1fd   :  { %2270 = vmatprep.subr.bf16.mxu1 %v2387_v0  ;;  %1410 = vadd.xlane.f32.xlu0 %v1409_v61 }
 0x200   :  { %2272 = vmatpush3.bf16.msra.mxu1 %v2580_v53 }
 0x201   :  { %2273 = vmatprep.subr.bf16.mxu1 %v2387_v0 }
 0x204   :  { %2275 = vmatpush3.bf16.msra.mxu1 %v2593_v57 }
 0x205   :  { %2276 = vmatprep.subr.bf16.mxu1 %v2387_v0 }
 0x208   :  { %2278 = vmatpush3.bf16.msra.mxu1 %v2600_v22 }
 0x209   :  { %2279 = vmatprep.subr.bf16.mxu1 %v2387_v0 }
 0x20c   :  { %2281 = vmatpush3.bf16.msra.mxu1 %v2674_v45 }
 0x20d   :  { %2282 = vmatprep.subr.bf16.mxu1 %v2387_v0 }
 0x210   :  { %2284 = vmatpush3.bf16.msra.mxu1 %v2678_v59 }
 0x211   :  { %2285 = vmatprep.subr.bf16.mxu1 %v2387_v0 }
 0x214   :  { %2287 = vmatpush3.bf16.msra.mxu1 %v2682_v63 }
 0x215   :  { %2288 = vmatprep.subr.bf16.mxu1 %v2387_v0 }
 0x218   :  { %2290 = vmatpush3.bf16.msra.mxu1 %v2688_v34 }
 0x219   :  { %2291 = vmatprep.subr.bf16.mxu1 %v2387_v0 }
 0x21b   :  { %1979 = vmatmul.mubr.f32.vlgmr.msra.gmra.mrb[6].mxu1 %v836_v5 }
 0x21c   :  { %2293 = vmatpush3.bf16.msra.mxu1 %v2292_v37  ;;  %2013 = vmatprep.mubr.msk.f32.mxu1 %vm2388_vm0, %v2389_v1 }
 0x21d   :  { %2294 = vmatprep.subr.bf16.mxu1 %v2387_v0 }
 0x220   :  { %2296 = vmatpush3.bf16.msra.mxu1 %v2295_v39 }
 0x221   :  { %2297 = vmatprep.subr.bf16.mxu1 %v2387_v0 }
 0x224   :  { %2299 = vmatpush3.bf16.msra.mxu1 %v2298_v47 }
 0x225   :  { %2300 = vmatprep.subr.bf16.mxu1 %v2387_v0 }
 0x228   :  { %2302 = vmatpush3.bf16.msra.mxu1 %v2301_v33 }
 0x229   :  { %2303 = vmatprep.subr.bf16.mxu1 %v2387_v0 }
 0x22c   :  { %2305 = vmatpush3.bf16.msra.mxu1 %v2304_v29 }
 0x22d   :  { %2306 = vmatprep.subr.bf16.mxu1 %v2387_v0 }
 0x230   :  { %2308 = vmatpush3.bf16.msra.mxu1 %v2307_v32 }
 0x231   :  { %2309 = vmatprep.subr.bf16.mxu1 %v2387_v0 }
 0x234   :  { %2311 = vmatpush3.bf16.msra.mxu1 %v2310_v14 }
 0x235   :  { %2312 = vmatprep.subr.bf16.mxu1 %v2387_v0 }
 0x238   :  { %2314 = vmatpush3.bf16.msra.mxu1 %v2313_v11 }
 0x239   :  { %2315 = vmatprep.subr.bf16.mxu1 %v2387_v0 }
 0x23b   :  { %2014 = vmatmul.mubr.f32.vlgmr.msra.gmra.mrb[8].mxu1 %v2797_v50 }
 0x23c   :  { %2317 = vmatpush3.bf16.msra.mxu1 %v2565_v46  ;;  %2048 = vmatprep.mubr.msk.f32.mxu1 %vm2388_vm0, %v2389_v1 }
 0x23d   :  { %2318 = vmatprep.subr.bf16.mxu1 %v2387_v0 }
 0x240   :  { %2320 = vmatpush3.bf16.msra.mxu1 %v2580_v53 }
 0x241   :  { %2321 = vmatprep.subr.bf16.mxu1 %v2387_v0 }
 0x244   :  { %2323 = vmatpush3.bf16.msra.mxu1 %v2593_v57 }
 0x245   :  { %2324 = vmatprep.subr.bf16.mxu1 %v2387_v0 }
 0x248   :  { %2326 = vmatpush3.bf16.msra.mxu1 %v2600_v22 }
 0x249   :  { %2327 = vmatprep.subr.bf16.mxu1 %v2387_v0 }
 0x24c   :  { %2329 = vmatpush3.bf16.msra.mxu1 %v2674_v45 }
 0x24d   :  { %2330 = vmatprep.subr.bf16.mxu1 %v2387_v0 }
 0x250   :  { %2332 = vmatpush3.bf16.msra.mxu1 %v2678_v59 }
 0x251   :  { %2333 = vmatprep.subr.bf16.mxu1 %v2387_v0 }
 0x254   :  { %2335 = vmatpush3.bf16.msra.mxu1 %v2682_v63  ;;  %v57_v63 = vld [vmem:[#allocation2 + $0x100] sm:$0x1] }
 0x255   :  { %2336 = vmatprep.subr.bf16.mxu1 %v2387_v0 }
 0x258   :  { %2338 = vmatpush3.bf16.msra.mxu1 %v2688_v34 }
 0x25b   :  { %2049 = vmatmul.mubr.f32.vlgmr.msra.gmra.mrb[10].mxu1 %v2797_v50 }
 0x26e   :  { %v738_v1 = vpop.xlane.xlu0 %737 }
 0x26f   :  { %v739_v46 = vrot.slane %v738_v1, 4 }
 0x271   :  { %v740_v53 = vadd.f32 %v739_v46, %v738_v1 }
 0x273   :  { %v741_v57 = vrot.slane %v740_v53, 2 }
 0x275   :  { %v742_v22 = vadd.f32 %v741_v57, %v740_v53 }
 0x277   :  { %v743_v45 = vrot.slane %v742_v22, 1 }
 0x279   :  { %v744_v41 = vadd.f32 %v743_v45, %v742_v22 }
 0x27b   :  { %2350 = vpush %v744_v41 }
 0x28a   :  { %v1411_v20 = vpop.xlane.xlu0 %1410 }
 0x28b   :  { %v1415_v18 = vrot.slane %v1411_v20, %v751_v13 }
 0x28e   :  { %v840_v16 = vpop.f32.mrb[0].mxu1 }
 0x28f   :  { %v1875_v59 = vpop.f32.mrb[1].mxu1 }
 0x2ac   :  { %s2351_s0 = spop %2350 }
 0x2ad   :  { %v746_v12 = vstv %s2351_s0 }
 0x2ae   :  { %v747_v0 = vmul.f32 0.015625, %v746_v12  ;;  %v991_v34 = vpop.f32.mrb[2].mxu1 }
 0x2af   :  { %v1910_v5 = vpop.f32.mrb[3].mxu1 }
 0x2b0   :  { %v748_v38 = vmul.f32 %v747_v0, %v57_v63 }
 0x2b2   :  { %v752_v54 = vrot.slane %v748_v38, %v751_v13 }
 0x2b4   :  { %v841_v60 = vadd.f32 %v840_v16, %v752_v54 }
 0x2b6   :  { %v992_v50 = vadd.f32 %v991_v34, %v841_v60 }
 0x2ce   :  { %v1095_v58 = vpop.f32.mrb[4].mxu1 }
 0x2cf   :  { %v1096_v8 = vadd.f32 %v1095_v58, %v992_v50  ;;  %v1945_v9 = vpop.f32.mrb[5].mxu1 }
 0x2ee   :  { %v1184_v24 = vpop.f32.mrb[6].mxu1 }
 0x2ef   :  { %v1185_v62 = vadd.f32 %v1184_v24, %v1096_v8  ;;  %v1980_v15 = vpop.f32.mrb[7].mxu1 }
 0x30e   :  { %v1303_v6 = vpop.f32.mrb[8].mxu1 }
 0x30f   :  { %v1304_v3 = vadd.f32 %v1303_v6, %v1185_v62  ;;  %v2015_v2 = vpop.f32.mrb[9].mxu1 }
 0x32e   :  { %v1390_v51 = vpop.f32.mrb[10].mxu1 }
 0x32f   :  { %v1391_v4 = vadd.f32 %v1390_v51, %v1304_v3  ;;  %v2050_v35 = vpop.f32.mrb[11].mxu1 }
 0x331   :  { %v1398_v7 = vadd.f32 %v1425_v40, %v1391_v4 }
 0x333   :  { %v1399_v27 = vmul.f32 0.2, %v1398_v7 }
 0x335   :  { %v1400_v44 = vmax.f32 %v1398_v7, %v1399_v27 }
 0x337   :  { %v1405_v30 = vmul.f32 %v1426_v52, %v1400_v44 }
 0x339   :  { %v1406_v28 = vsel %vm710_vm1, %v1405_v30, 0.0 }
 0x33a   :  { %1407 = vadd.xlane.f32.xlu1 %v1406_v28 }
 0x3c7   :  { %v1408_v55 = vpop.xlane.xlu1 %1407 }
 0x3c8   :  { %v1416_v31 = vadd.f32 %v1415_v18, %v1408_v55 }
 0x3ca   :  { %1418 = vst.msk [vmem:[%s2944_s2] sm:$0x3] %vm1417_vm5, %v1416_v31 }
 0x3cb   :  { %1423 = vsyncpa [#allocation3], 1 }

</bundles_post_ra>
